<compile_context>
chip_gen: v6e
topology: v6e:2x2x1
jax: 0.10.0
libtpu: 0.0.40
codegen_flags: <defaults>
</compile_context>

<pallas_src>
import math

import jax
import jax.numpy as jnp
from jax.experimental import pallas as pl
from jax.experimental.pallas import tpu as pltpu


def _sinusoidal_kernel(t_ref, f_ref, p_ref, o_ref):
    # t_ref: (TB, 1) f32   time tile
    # f_ref: (1, dim) f32  resident [freqs, freqs]
    # p_ref: (1, dim) f32  resident [0, ..., 0, pi/2, ..., pi/2]
    # o_ref: (TB, dim)     output tile
    # One broadcast multiply + add + one sin -> one unmasked full-block store.
    arg = t_ref[...] * f_ref[...] + p_ref[...]
    o_ref[...] = jnp.sin(arg).astype(o_ref.dtype)


def sinusoidal_position_embeddings(time: jax.Array, dim: int, *,
                                   block_b: int = 1024,
                                   out_dtype=jnp.float32,
                                   force_kernel: bool = False) -> jax.Array:
    """time: (B,) float array -> (B, dim) embeddings (out_dtype, default f32)."""
    assert dim % 2 == 0 and dim >= 4, "dim must be even and >= 4"
    b = time.shape[0]
    half = dim // 2

    # Loop-invariant frequencies, computed once outside the kernel (bit-exact
    # match with the reference for the frequency values).
    scale = math.log(10000.0) / (half - 1)
    freqs = jnp.exp(jnp.arange(half, dtype=jnp.float32) * -scale)

    # ----- tile sizing (VMEM-aware) -----
    # Dominant VMEM user is the double-buffered output block: 2 * tb * dim * 4.
    vmem_budget = 16 * 1024 * 1024            # conservative: fits v7x scoped VMEM
    tb_cap = max(8, (vmem_budget // (dim * 4 * 2)) // 8 * 8)
    tb = max(8, min(block_b, max(b, 1), tb_cap))
    tb = ((tb + 7) // 8) * 8

    # ----- small-batch fallback -----
    # If the whole batch fits in a single tile, the pallas_call fixed overhead
    # (~1-2 us) dominates this tiny elementwise op; let XLA fuse it instead.
    single_tile = pl.cdiv(b, tb) == 1
    if single_tile and not force_kernel:
        emb = time.astype(jnp.float32)[:, None] * freqs[None, :]
        return jnp.concatenate([jnp.sin(emb), jnp.cos(emb)],
                               axis=-1).astype(out_dtype)

    padded_b = pl.cdiv(b, tb) * tb
    # Force >= 2 grid steps when possible so the "parallel" batch axis can
    # shard across v7x's two TensorCores (kernel is VALU-bound -> ~2x there).
    if padded_b // tb == 1 and padded_b >= 16:
        tb = ((padded_b // 2 + 7) // 8) * 8
        padded_b = pl.cdiv(b, tb) * tb

    # Resident (1, dim) tables: [freqs | freqs] and phase [0 | pi/2].
    freqs_full = jnp.concatenate([freqs, freqs]).reshape(1, dim)
    phase = jnp.concatenate([
        jnp.zeros((half,), jnp.float32),
        jnp.full((half,), math.pi / 2.0, dtype=jnp.float32),
    ]).reshape(1, dim)

    t2d = time.astype(jnp.float32).reshape(b, 1)
    if padded_b != b:
        t2d = jnp.pad(t2d, ((0, padded_b - b), (0, 0)))

    out = pl.pallas_call(
        _sinusoidal_kernel,
        out_shape=jax.ShapeDtypeStruct((padded_b, dim), out_dtype),
        grid_spec=pltpu.PrefetchScalarGridSpec(
            num_scalar_prefetch=0,
            grid=(padded_b // tb,),
            in_specs=[
                pl.BlockSpec((tb, 1), lambda i: (i, 0)),     # time tile
                pl.BlockSpec((1, dim), lambda i: (0, 0)),    # resident freqs
                pl.BlockSpec((1, dim), lambda i: (0, 0)),    # resident phase
            ],
            out_specs=pl.BlockSpec((tb, dim), lambda i: (i, 0)),
        ),
        compiler_params=pltpu.CompilerParams(
            dimension_semantics=("parallel",),               # megacore on v7x
        ),
        cost_estimate=pl.CostEstimate(
            flops=2 * padded_b * dim,                        # mul + add
            transcendentals=padded_b * dim,                  # sin (VPU polynomial)
            bytes_accessed=(padded_b * (1 + dim) + 2 * dim) * 4,
        ),
    )(t2d, freqs_full, phase)

    return out[:b]


def _reference(time: jax.Array, dim: int) -> jax.Array:
    half = dim // 2
    emb = math.log(10000.0) / (half - 1)
    freqs = jnp.exp(jnp.arange(half, dtype=jnp.float32) * -emb)
    emb = time.astype(jnp.float32)[:, None] * freqs[None, :]
    return jnp.concatenate([jnp.sin(emb), jnp.cos(emb)], axis=-1)


if __name__ == "__main__":
    key = jax.random.PRNGKey(0)

    # Case 1: lane-dense dim, kernel path forced (2 grid steps after split).
    batch, dim = 32, 256
    time = jax.random.uniform(key, (batch,), dtype=jnp.float32) * 1000.0

    out = sinusoidal_position_embeddings(time, dim, force_kernel=True)
    out = jax.block_until_ready(out)
    ref = _reference(time, dim)
    assert out.shape == (batch, dim), out.shape
    assert out.dtype == jnp.float32, out.dtype
    # sin/cos of ~1e3-radian f32 args only carry ~4-5 good digits; the pi/2
    # phase fusion adds at most ~1 argument ULP on top of that.
    assert jnp.allclose(out, ref, atol=2e-3, rtol=2e-3), (
        float(jnp.max(jnp.abs(out - ref)))
    )

    # Case 2: ragged batch + non-128-aligned half (padding + full-dim block).
    batch2, dim2 = 13, 96
    time2 = jax.random.uniform(jax.random.PRNGKey(1), (batch2,),
                               dtype=jnp.float32) * 1000.0
    out2 = jax.block_until_ready(
        sinusoidal_position_embeddings(time2, dim2, force_kernel=True))
    ref2 = _reference(time2, dim2)
    assert out2.shape == (batch2, dim2), out2.shape
    assert jnp.allclose(out2, ref2, atol=2e-3, rtol=2e-3), (
        float(jnp.max(jnp.abs(out2 - ref2)))
    )

    # Case 3: default small-batch path (plain-JAX fallback, no pallas_call).
    out_fb = jax.block_until_ready(sinusoidal_position_embeddings(time, dim))
    assert jnp.allclose(out_fb, ref, atol=2e-3, rtol=2e-3)

    print("KERNEL_OK")
</pallas_src>

<mosaic_0001>
module attributes {stable_mosaic.version = 11 : i64} {
  func.func @_sinusoidal_kernel(%arg0: i32, %arg1: memref<16x1xf32, #tpu.memory_space<vmem>>, %arg2: memref<1x256xf32, #tpu.memory_space<vmem>>, %arg3: memref<1x256xf32, #tpu.memory_space<vmem>>, %arg4: memref<16x256xf32, #tpu.memory_space<vmem>>) attributes {dimension_semantics = [#tpu.dimension_semantics<parallel>], iteration_bounds = array<i64: 2>, scalar_prefetch = 0 : i64, scratch_operands = 0 : i64, tpu.core_type = #tpu.core_type<tc>, window_params = [{transform_indices = @transform_0, window_bounds = array<i64: 16, 1>}, {pipeline_mode = #tpu.pipeline_mode<synchronous>, transform_indices = @transform_1, window_bounds = array<i64: 1, 256>}, {pipeline_mode = #tpu.pipeline_mode<synchronous>, transform_indices = @transform_2, window_bounds = array<i64: 1, 256>}, {transform_indices = @transform_3, window_bounds = array<i64: 16, 256>}]} {
    %c0 = arith.constant 0 : index
    %c0_0 = arith.constant 0 : index
    %0 = vector.load %arg1[%c0, %c0_0] : memref<16x1xf32, #tpu.memory_space<vmem>>, vector<16x1xf32>
    %c0_1 = arith.constant 0 : index
    %c0_2 = arith.constant 0 : index
    %1 = vector.load %arg2[%c0_1, %c0_2] : memref<1x256xf32, #tpu.memory_space<vmem>>, vector<1x256xf32>
    %2 = vector.broadcast %0 : vector<16x1xf32> to vector<16x256xf32>
    %3 = vector.broadcast %1 : vector<1x256xf32> to vector<16x256xf32>
    %4 = arith.mulf %2, %3 : vector<16x256xf32>
    %c0_3 = arith.constant 0 : index
    %c0_4 = arith.constant 0 : index
    %5 = vector.load %arg3[%c0_3, %c0_4] : memref<1x256xf32, #tpu.memory_space<vmem>>, vector<1x256xf32>
    %6 = vector.broadcast %5 : vector<1x256xf32> to vector<16x256xf32>
    %7 = arith.addf %4, %6 : vector<16x256xf32>
    %8 = math.sin %7 : vector<16x256xf32>
    %c0_5 = arith.constant 0 : index
    %c0_6 = arith.constant 0 : index
    %9 = vector.load %arg4[%c0_5, %c0_6] : memref<16x256xf32, #tpu.memory_space<vmem>>, vector<16x256xf32>
    tpu.vector_store %arg4[%c0_5, %c0_6], %8 {strides = array<i32>} : memref<16x256xf32, #tpu.memory_space<vmem>>, vector<16x256xf32>,
    return
  }
  func.func @transform_0(%arg0: i32) -> (i32, i32) {
    %c0_i32 = arith.constant 0 : i32
    %c0_i32_0 = arith.constant 0 : i32
    return %arg0, %c0_i32 : i32, i32
  }
  func.func @transform_1(%arg0: i32) -> (i32, i32) {
    %c0_i32 = arith.constant 0 : i32
    %c0_i32_0 = arith.constant 0 : i32
    %c0_i32_1 = arith.constant 0 : i32
    return %c0_i32, %c0_i32_0 : i32, i32
  }
  func.func @transform_2(%arg0: i32) -> (i32, i32) {
    %c0_i32 = arith.constant 0 : i32
    %c0_i32_0 = arith.constant 0 : i32
    %c0_i32_1 = arith.constant 0 : i32
    return %c0_i32, %c0_i32_0 : i32, i32
  }
  func.func @transform_3(%arg0: i32) -> (i32, i32) {
    %c0_i32 = arith.constant 0 : i32
    %c0_i32_0 = arith.constant 0 : i32
    return %arg0, %c0_i32 : i32, i32
  }
}

</mosaic_0001>

<bundles_post_ra>
// kernel: tpu_custom_call.1
= control target key start
LH: loop header
LB: loop body
LE: loop exit
PB: predicated region body
PF: predicated region fallthrough
CT: control target
= control target key end

     0   :  { %8 = vsyncpa [#allocation3], 0  ;;  %s1319_s0 = inlined_call_operand.vmem [shape: f32[32,1], index: 0, kind: input, shape index: {}]   ;;  %s1320_s1 = inlined_call_operand.vmem [shape: f32[1,256], index: 1, kind: input, shape index: {}]   ;;  %s1321_s2 = inlined_call_operand.vmem [shape: f32[1,256], index: 2, kind: input, shape index: {}]   ;;  %s1322_s3 = inlined_call_operand.hbm [shape: f32[32,256], index: 3, kind: output, shape index: {}]  }
   0x1   :  { %10 = vsyncpa [#allocation3 + $0x1], 0  ;;  %s917_s12 = smov 0   ;;  %s919_s13 = smov 0  }
   0x2   :  { %s921_s14 = smov 0   ;;  %s923_s15 = smov 0  }
   0x3 LB: > { %s938_s16 = sadd.s32 4294967295, %s885_s15   ;;  %s713_s17 = sadd.s32 4294967294, %s885_s15   ;;  %s885_s15 = sphi %s923_s15, %s1332_s15   ;;  %s881_s14 = sphi %s921_s14, %s1331_s14   ;;  %s877_s13 = sphi %s919_s13, %s1330_s13   ;;  %s873_s12 = sphi %s917_s12, %s1329_s12  }
   0x4   : > { %s942_s18 = sadd.s32 1, %s885_s15   ;;  %s91_s19 = sadd.s32 1, %s881_s14 }
   0x5   : > { %s88_s20 = ssub.s32 %s885_s15, %s942_s18  ;;  %p101_p0 = scmp.ne.s32.totalorder %s881_s14, %s877_s13 }
   0x6   : > { %p89_p1 = scmp.eq.s32.totalorder %s88_s20, 0  ;;  %p102_p2 = scmp.eq.s32.totalorder %s938_s16, 1 }
   0x7   : > { %p107_p3 = scmp.ne.s32.totalorder %s877_s13, %s873_s12  ;;  %p108_p4 = scmp.eq.s32.totalorder %s713_s17, 1 }
   0x8   : > { %s953_s21 = scalar_select %p89_p1, %s881_s14, %s91_s19  }
   0x9   : > { %p955_p5 = por %p102_p2, %p101_p0  ;;  %p959_p6 = por %p108_p4, %p107_p3 }
   0xa   : > { %p716_p7 = scmp.ge.s32.totalorder %s885_s15, 1  ;;  %p141_p8 = scmp.lt.s32.totalorder %s885_s15, 3 }
   0xc   : > { %p142_p9 = pnand %p716_p7, %p141_p8 }
   0xd   : > { %s718_s24 = sshll.u32 (!%p142_p9), %s938_s16, 1  ;;  %s162_s6 = sand.u32 (!%p142_p9), 1, %s877_s13  }
   0xe   : > { %145 = sbr.rel (%p142_p9) target bundleno = 303 (0x12f), region = 32  ;;  %p166_p10 = scmp.lt.s32.totalorder (!%p142_p9), %s718_s24, 3 }
   0xf   : > { %s717_s7 = sshll.u32 (!%p142_p9), %s162_s6, 5  ;;  %s743_s9 = sshll.u32 (!%p142_p9), %s938_s16, 9 }
  0x10   : > { %s1242_s8 = scalar_lea.vmem (!%p142_p9), [#allocation2], %s717_s7  ;;  %s1271_s19 = scalar_lea.hbm (!%p142_p9), %s1322_s3, %s743_s9 }
  0x11   : > { %s651_s10 = sshll.u32 (!%p142_p9), %s1242_s8, 4  ;;  %s1279_s16 = scalar_lea.sflag (!%p142_p9), [#allocation3], %s162_s6  ;;  %s1273_s10 = int_to_ptr.vmem [resolvable:$true] %s651_s10 }
  0x12   : > { %s825_s20 = scalar_lea.vmem (!%p142_p9), %s1273_s10, 512 }
  0x13   : > { %v887_v0 = vmov 0   ;;  %s1334_s24 = smov (!%p166_p10, %s718_s24), 3  ;;  %v186_v3 = vlaneseq  ;;  %v174_v7 = vld [vmem:[%s1320_s1] sm:$0x3]  ;;  %v888_v47 = vmov 683565275   ;;  %p826_p11 = scmp.ne.s32.totalorder %s1273_s10, %s825_s20 }
  0x14   : > { %808 = vset.pattern.permute.xlu0 %v887_v0  ;;  %s719_s25 = sshll.u32 %s1334_s24, 3  ;;  %v200_v8 = vld [vmem:[%s1321_s2] sm:$0x3]  ;;  %v889_v51 = vmov 2475754826   ;;  %s894_s24 = smov [#allocation2]  }
  0x15   : > { %s169_s28 = scalar_lea.vmem %s1319_s0, %s719_s25  ;;  %v187_v4 = vshrl.u32 %v186_v3, 7  ;;  %v890_v53 = vmov 2131351028   ;;  %v891_v55 = vmov 2102212464   ;;  %p827_p12 = pnand %p826_p11, %p955_p5 }
  0x16   : > { %v172_v1 = vld [vmem:[%s169_s28] sm:$0xff]  ;;  %v173_v2 = vld [vmem:[%s169_s28 + $0x8] sm:$0xff]  ;;  %v892_v57 = vmov 920167782   ;;  %v893_v0 = vmov 1326507024  }
  0x17   : > { %177 = vperm.xlu0 %808, %v172_v1   ;;  %v188_v5 = vsub.s32 0, %v187_v4  ;;  %v192_v6 = vsub.s32 1, %v187_v4  ;;  %p828_p13 = pneg %p827_p12  ;;  %s829_s25 = sshll.u32 %s894_s24, 4  ;;  %s830_s25 = int_to_ptr.vmem [resolvable:$false] %s829_s25 }
  0x18   : > { %s831_s26 = scalar_lea.vmem %s830_s25, 1024  ;;  %p832_p0 = scmp.lt.s32.totalorder %s1273_s10, %s830_s25 }
  0x19   : > { %v189_v9 = vrot.slane %v174_v7, %v188_v5  ;;  %v193_v10 = vrot.slane %v174_v7, %v192_v6  ;;  %v205_v11 = vrot.slane %v200_v8, %v188_v5  ;;  %v209_v12 = vrot.slane %v200_v8, %v192_v6  ;;  %p833_p1 = scmp.lt.s32.totalorder %s831_s26, %s825_s20 }
  0x1b   : > { %182 = vperm.xlu0 %808, %v173_v2   ;;  %p834_p2 = por %p833_p1, %p832_p0 }
  0x1d   : > { %p835_p3 = pnand %p834_p2, %p828_p13 }
  0x92   : > { %v178_v13 = vpop.permute.xlu0 %177 }
  0x93   : > { %v196_v14 = vmul.f32 %v189_v9, %v178_v13  ;;  %v197_v15 = vmul.f32 %v193_v10, %v178_v13 }
  0x95   : > { %v975_v16 = vadd.f32 %v205_v11, %v196_v14  ;;  %v977_v17 = vadd.f32 %v209_v12, %v197_v15 }
  0x96   : > { %v183_v18 = vpop.permute.xlu0 %182 }
  0x97   : > { %v198_v19 = vmul.f32 %v189_v9, %v183_v18  ;;  %v216_v20 = vand.u32 2147483647, %v975_v16  ;;  %v219_v21 = vand.u32 2139095040, %v975_v16  ;;  %v320_v22 = vand.u32 2147483647, %v977_v17 }
  0x98   : > { %v323_v25 = vand.u32 2139095040, %v977_v17  ;;  %v199_v34 = vmul.f32 %v193_v10, %v183_v18  ;;  %vm218_vm14 = vcmp.lt.s32.totalorder %v975_v16, 0 }
  0x99   : > { %v982_v23 = vadd.f32 %v205_v11, %v198_v19  ;;  %v220_v24 = vshrl.u32 %v219_v21, 23  ;;  %v223_v26 = vand.u32 8388607, %v216_v20  ;;  %v327_v27 = vand.u32 8388607, %v320_v22 }
  0x9a   : > { %v324_v29 = vshrl.u32 %v323_v25, 23  ;;  %v990_v42 = vadd.f32 %v209_v12, %v199_v34 }
  0x9b   : > { %v720_v28 = vadd.s32 4294967169, %v220_v24  ;;  %v427_v30 = vand.u32 2139095040, %v982_v23  ;;  %v224_v35 = vor.u32 8388608, %v223_v26  ;;  %v328_v36 = vor.u32 8388608, %v327_v27 }
  0x9c   : > { %v724_v32 = vadd.s32 4294967169, %v324_v29  ;;  %v424_v45 = vand.u32 2147483647, %v982_v23 }
  0x9d   : > { %v226_v31 = vadd.s32 1, %v720_v28  ;;  %v428_v33 = vshrl.u32 %v427_v30, 23  ;;  %v992_v43 = vshll.u32 %v224_v35, 8  ;;  %v994_v44 = vshll.u32 %v328_v36, 8 }
  0x9e   : > { %v330_v37 = vadd.s32 1, %v724_v32 }
  0x9f   : > { %vm227_vm0 = vcmp.gt.s32.totalorder %v226_v31, 0  ;;  %v728_v38 = vadd.s32 4294967169, %v428_v33 }
  0xa0   : > { %v228_v39 = vsel %vm227_vm0, %v226_v31, 0  ;;  %vm331_vm1 = vcmp.gt.s32.totalorder %v330_v37, 0 }
  0xa1   : > { %v229_v40 = vshrl.u32 %v228_v39, 5  ;;  %v230_v41 = vand.u32 31, %v228_v39  ;;  %v332_v49 = vsel %vm331_vm1, %v330_v37, 0  ;;  %v998_v50 = vadd.s32 1, %v728_v38 }
  0xa2   : > { %v334_v7 = vand.u32 31, %v332_v49  ;;  %v333_v24 = vshrl.u32 %v332_v49, 5 }
  0xa3   : > { %v231_v46 = vsub.s32 32, %v230_v41  ;;  %v233_v48 = vshll.u32 %v888_v47, %v230_v41  ;;  %v236_v52 = vshll.u32 %v889_v51, %v230_v41  ;;  %v239_v54 = vshll.u32 %v890_v53, %v230_v41 }
  0xa4   : > { %v242_v56 = vshll.u32 %v891_v55, %v230_v41  ;;  %v245_v58 = vshll.u32 %v892_v57, %v230_v41  ;;  %vm248_vm2 = vcmp.lt.s32.totalorder %v229_v40, 1  ;;  %vm249_vm3 = vcmp.lt.s32.totalorder %v229_v40, 2 }
  0xa5   : > { %v234_v59 = vshrl.u32 %v889_v51, %v231_v46  ;;  %v237_v60 = vshrl.u32 %v890_v53, %v231_v46  ;;  %v240_v61 = vshrl.u32 %v891_v55, %v231_v46  ;;  %v232_v62 = vshrl.u32 %v888_v47, %v231_v46 }
  0xa6   : > { %v243_v63 = vshrl.u32 %v892_v57, %v231_v46  ;;  %v246_v1 = vshrl.u32 %v893_v0, %v231_v46  ;;  %vm250_vm4 = vcmp.lt.s32.totalorder %v229_v40, 3  ;;  %vm251_vm5 = vcmp.lt.s32.totalorder %v229_v40, 4 }
  0xa7   : > { %v235_v2 = vor.u32 %v234_v59, %v233_v48  ;;  %v238_v3 = vor.u32 %v237_v60, %v236_v52  ;;  %v241_v4 = vor.u32 %v240_v61, %v239_v54  ;;  %v335_v15 = vsub.s32 32, %v334_v7 }
  0xa8   : > { %v244_v5 = vor.u32 %v243_v63, %v242_v56  ;;  %v247_v6 = vor.u32 %v246_v1, %v245_v58  ;;  %v337_v27 = vshll.u32 %v888_v47, %v334_v7  ;;  %vm435_vm6 = vcmp.gt.s32.totalorder %v998_v50, 0 }
  0xa9   : > { %v252_v8 = vsel %vm248_vm2, %v232_v62, %v235_v2  ;;  %v253_v9 = vsel %vm251_vm5, %v241_v4, 2102212464  ;;  %v256_v10 = vsel %vm248_vm2, %v235_v2, %v238_v3  ;;  %v260_v11 = vsel %vm248_vm2, %v238_v3, %v241_v4 }
  0xaa   : > { %v254_v12 = vsel %vm250_vm4, %v238_v3, %v253_v9  ;;  %v257_v13 = vsel %vm251_vm5, %v244_v5, 920167782  ;;  %v261_v14 = vsel %vm251_vm5, %v247_v6, 1326507024  ;;  %v338_v33 = vshrl.u32 %v889_v51, %v335_v15 }
  0xab   : > { %v255_v18 = vsel %vm249_vm3, %v252_v8, %v254_v12  ;;  %v258_v19 = vsel %vm250_vm4, %v241_v4, %v257_v13  ;;  %v262_v21 = vsel %vm250_vm4, %v244_v5, %v261_v14  ;;  %v340_v34 = vshll.u32 %v889_v51, %v334_v7 }
  0xac   : > { %v259_v25 = vsel %vm249_vm3, %v256_v10, %v258_v19  ;;  %v263_v26 = vsel %vm249_vm3, %v260_v11, %v262_v21  ;;  %v271_v32 = vmul.u32 %v992_v43, %v255_v18  ;;  %v341_v35 = vshrl.u32 %v890_v53, %v335_v15 }
  0xad   : > { %v1019_v28 = vmul.u32.u64.low %v992_v43, %v263_v26  ;;  %v1020_v29 = vmul.u32.u64.high %v992_v43, %v263_v26, %v1019_v28  ;;  %v1023_v30 = vmul.u32.u64.low %v992_v43, %v259_v25  ;;  %v1024_v31 = vmul.u32.u64.high %v992_v43, %v259_v25, %v1023_v30 }
  0xae   : > { %v343_v36 = vshll.u32 %v890_v53, %v334_v7  ;;  %v344_v37 = vshrl.u32 %v891_v55, %v335_v15  ;;  %v346_v38 = vshll.u32 %v891_v55, %v334_v7  ;;  %v347_v39 = vshrl.u32 %v892_v57, %v335_v15 }
  0xaf   : > { %v339_v40 = vor.u32 %v338_v33, %v337_v27  ;;  %v342_v41 = vor.u32 %v341_v35, %v340_v34  ;;  %v349_v46 = vshll.u32 %v892_v57, %v334_v7  ;;  %v350_v43 = vshrl.u32 %v893_v0, %v335_v15 }
  0xb0   : > { %vm273_vm7 = vc.u32 %v1020_v29, %v1023_v30  ;;  %v274_v48 = vadd.s32 1, %v1024_v31  ;;  %v336_v49 = vshrl.u32 %v888_v47, %v335_v15  ;;  %v345_v52 = vor.u32 %v344_v37, %v343_v36 }
  0xb1   : > { %v348_v54 = vor.u32 %v347_v39, %v346_v38  ;;  %v351_v56 = vor.u32 %v350_v43, %v349_v46  ;;  %vm352_vm8 = vcmp.lt.s32.totalorder %v333_v24, 1  ;;  %vm353_vm9 = vcmp.lt.s32.totalorder %v333_v24, 2 }
  0xb2   : > { %v275_v58 = vsel %vm273_vm7, %v274_v48, %v1024_v31  ;;  %vm354_vm10 = vcmp.lt.s32.totalorder %v333_v24, 3  ;;  %vm355_vm11 = vcmp.lt.s32.totalorder %v333_v24, 4  ;;  %v360_v59 = vsel %vm352_vm8, %v339_v40, %v342_v41 }
  0xb3   : > { %v276_v60 = vadd.s32 %v275_v58, %v271_v32  ;;  %v357_v61 = vsel %vm355_vm11, %v345_v52, 2102212464  ;;  %v361_v62 = vsel %vm355_vm11, %v348_v54, 920167782  ;;  %v364_v63 = vsel %vm352_vm8, %v342_v41, %v345_v52 }
  0xb4   : > { %v356_v1 = vsel %vm352_vm8, %v336_v49, %v339_v40  ;;  %v358_v2 = vsel %vm354_vm10, %v342_v41, %v357_v61  ;;  %v362_v3 = vsel %vm354_vm10, %v345_v52, %v361_v62  ;;  %v365_v4 = vsel %vm355_vm11, %v351_v56, 1326507024 }
  0xb5   : > { %v277_v5 = vadd.s32 536870912, %v276_v60  ;;  %v363_v6 = vsel %vm353_vm9, %v360_v59, %v362_v3  ;;  %v366_v7 = vsel %vm354_vm10, %v348_v54, %v365_v4  ;;  %v436_v8 = vsel %vm435_vm6, %v998_v50, 0 }
  0xb6   : > { %v367_v9 = vsel %vm353_vm9, %v364_v63, %v366_v7  ;;  %v1048_v10 = vmul.u32.u64.low %v994_v44, %v363_v6  ;;  %v1049_v11 = vmul.u32.u64.high %v994_v44, %v363_v6, %v1048_v10  ;;  %v531_v12 = vand.u32 2139095040, %v990_v42 }
  0xb7   : > { %v1053_v13 = vshrl.u32 %v277_v5, 30  ;;  %v1056_v14 = vmul.u32.u64.low %v994_v44, %v367_v9  ;;  %v1057_v15 = vmul.u32.u64.high %v994_v44, %v367_v9, %v1056_v14  ;;  %v359_v18 = vsel %vm353_vm9, %v356_v1, %v358_v2 }
  0xb8   : > { %v438_v19 = vand.u32 31, %v436_v8  ;;  %v431_v21 = vand.u32 8388607, %v424_v45  ;;  %v378_v25 = vadd.s32 1, %v1049_v11  ;;  %v532_v27 = vshrl.u32 %v531_v12, 23 }
  0xb9   : > { %v279_v50 = vshll.u32 %v1053_v13, 30  ;;  %v375_v31 = vmul.u32 %v994_v44, %v359_v18  ;;  %vm377_vm12 = vc.u32 %v1057_v15, %v1048_v10  ;;  %v1069_v36 = vshrl.u32 %v436_v8, 5 }
  0xba   : > { %v439_v26 = vsub.s32 32, %v438_v19  ;;  %v379_v32 = vsel %vm377_vm12, %v378_v25, %v1049_v11  ;;  %v432_v34 = vor.u32 8388608, %v431_v21  ;;  %v732_v38 = vadd.s32 4294967169, %v532_v27 }
  0xbb   : > { %v280_v28 = vsub.s32 %v276_v60, %v279_v50  ;;  %v380_v33 = vadd.s32 %v379_v32, %v375_v31  ;;  %v441_v41 = vshll.u32 %v888_v47, %v438_v19  ;;  %v444_v46 = vshll.u32 %v889_v51, %v438_v19 }
  0xbc   : > { %v442_v35 = vshrl.u32 %v889_v51, %v439_v26  ;;  %v445_v37 = vshrl.u32 %v890_v53, %v439_v26  ;;  %v448_v44 = vshrl.u32 %v891_v55, %v439_v26  ;;  %v450_v43 = vshll.u32 %v891_v55, %v438_v19 }
  0xbd   : > { %v282_v24 = vsub.s32 0, %v280_v28  ;;  %v381_v40 = vadd.s32 536870912, %v380_v33  ;;  %v451_v48 = vshrl.u32 %v892_v57, %v439_v26  ;;  %v454_v49 = vshrl.u32 %v893_v0, %v439_v26 }
  0xbe   : > { %v443_v54 = vor.u32 %v442_v35, %v441_v41  ;;  %v447_v56 = vshll.u32 %v890_v53, %v438_v19  ;;  %v1079_v58 = vshll.u32 %v432_v34, 8  ;;  %v446_v60 = vor.u32 %v445_v37, %v444_v46 }
  0xbf   : > { %v721_v39 = vmin.u32 %v282_v24, %v280_v28  ;;  %v1081_v59 = vshrl.u32 %v381_v40, 30  ;;  %v452_v61 = vor.u32 %v451_v48, %v450_v43  ;;  %v453_v62 = vshll.u32 %v892_v57, %v438_v19 }
  0xc0   : > { %v272_v63 = vadd.s32 %v1023_v30, %v1020_v29  ;;  %v449_v2 = vor.u32 %v448_v44, %v447_v56  ;;  %vm459_vm13 = vcmp.lt.s32.totalorder %v1069_v36, 4  ;;  %v538_v6 = vadd.s32 1, %v732_v38 }
  0xc1   : > { %v284_v52 = vclz %v721_v39  ;;  %v383_v3 = vshll.u32 %v1081_v59, 30  ;;  %v455_v4 = vor.u32 %v454_v49, %v453_v62  ;;  %v465_v5 = vsel %vm459_vm13, %v452_v61, 920167782 }
  0xc2   : > { %v302_v7 = vsub.s32 4, %v1053_v13  ;;  %vm456_vm0 = vcmp.lt.s32.totalorder %v1069_v36, 1  ;;  %vm457_vm1 = vcmp.lt.s32.totalorder %v1069_v36, 2  ;;  %vm458_vm2 = vcmp.lt.s32.totalorder %v1069_v36, 3 }
  0xc3   : > { %v722_v1 = vadd.s32 4294967294, %v284_v52  ;;  %v1094_v30 = vsub.s32 %v380_v33, %v383_v3  ;;  %v464_v8 = vsel %vm456_vm0, %v443_v54, %v446_v60  ;;  %v466_v12 = vsel %vm458_vm2, %v449_v2, %v465_v5 }
  0xc4   : > { %v468_v14 = vsel %vm456_vm0, %v446_v60, %v449_v2  ;;  %v440_v19 = vshrl.u32 %v888_v47, %v439_v26  ;;  %v461_v50 = vsel %vm459_vm13, %v449_v2, 2102212464  ;;  %v469_v21 = vsel %vm459_vm13, %v455_v4, 1326507024 }
  0xc5   : > { %vm723_vm15 = vcmp.lt.s32.totalorder %v722_v1, 0  ;;  %v386_v18 = vsub.s32 0, %v1094_v30  ;;  %v470_v32 = vsel %vm458_vm2, %v452_v61, %v469_v21  ;;  %v467_v33 = vsel %vm457_vm1, %v464_v8, %v466_v12 }
  0xc6   : > { %v287_v29 = vsel %vm723_vm15, 0, %v722_v1  ;;  %v471_v26 = vsel %vm457_vm1, %v468_v14, %v470_v32  ;;  %vm539_vm3 = vcmp.gt.s32.totalorder %v538_v6, 0  ;;  %v460_v39 = vsel %vm456_vm0, %v440_v19, %v443_v54 }
  0xc7   : > { %v288_v9 = vsub.s32 32, %v287_v29  ;;  %v292_v11 = vsub.s32 4294967266, %v287_v29  ;;  %v289_v25 = vshll.u32 %v280_v28, %v287_v29  ;;  %v725_v24 = vmin.u32 %v386_v18, %v1094_v30 }
  0xc8   : > { %v1117_v37 = vmul.u32.u64.low %v1079_v58, %v471_v26  ;;  %v1118_v38 = vmul.u32.u64.high %v1079_v58, %v471_v26, %v1117_v37  ;;  %v462_v40 = vsel %vm458_vm2, %v446_v60, %v461_v50  ;;  %v528_v41 = vand.u32 2147483647, %v990_v42 }
  0xc9   : > { %v290_v27 = vshrl.u32 %v272_v63, %v288_v9  ;;  %v293_v31 = vadd.s32 127, %v292_v11  ;;  %v388_v28 = vclz %v725_v24  ;;  %v303_v46 = vsel %vm218_vm14, %v302_v7, %v1053_v13 }
  0xca   : > { %v1129_v43 = vmul.u32.u64.low %v1079_v58, %v467_v33  ;;  %v1130_v48 = vmul.u32.u64.high %v1079_v58, %v467_v33, %v1129_v43  ;;  %v540_v52 = vsel %vm539_vm3, %v538_v6, 0  ;;  %vm1135_vm4 = vcmp.le.f32.partialorder %v216_v20, 0.7853982 }
  0xcb   : > { %v291_v34 = vor.u32 %v290_v27, %v289_v25  ;;  %v294_v35 = vshll.u32 %v293_v31, 23  ;;  %v726_v49 = vadd.s32 4294967294, %v388_v28  ;;  %v463_v61 = vsel %vm457_vm1, %v460_v39, %v462_v40 }
  0xcc   : > { %v305_v13 = vsel %vm1135_vm4, 0, %v303_v46  ;;  %vm481_vm6 = vc.u32 %v1118_v38, %v1129_v43  ;;  %v542_v62 = vand.u32 31, %v540_v52  ;;  %v482_v20 = vadd.s32 1, %v1130_v48 }
  0xcd   : > { %v295_v44 = vor.u32 4788187, %v294_v35  ;;  %v298_v60 = vcvt.s32.f32 %v291_v34  ;;  %vm727_vm5 = vcmp.lt.s32.totalorder %v726_v49, 0  ;;  %v1148_v2 = vand.u32 8388607, %v528_v41 }
  0xce   : > { %v391_v1 = vsel %vm727_vm5, 0, %v726_v49  ;;  %v376_v36 = vadd.s32 %v1048_v10, %v1057_v15  ;;  %v479_v5 = vmul.u32 %v1079_v58, %v463_v61  ;;  %v309_v7 = vadd.s32 3, %v305_v13 }
  0xcf   : > { %v296_v56 = vand.u32 2147483647, %v295_v44  ;;  %v392_v3 = vsub.s32 32, %v391_v1  ;;  %v396_v4 = vsub.s32 4294967266, %v391_v1  ;;  %v483_v29 = vsel %vm481_vm6, %v482_v20, %v1130_v48 }
  0xd0   : > { %v543_v8 = vsub.s32 32, %v542_v62  ;;  %vm322_vm7 = vcmp.lt.s32.totalorder %v977_v17, 0  ;;  %v393_v9 = vshll.u32 %v1094_v30, %v391_v1  ;;  %v484_v14 = vadd.s32 %v483_v29, %v479_v5 }
  0xd1   : > { %v299_v63 = vmul.f32 %v298_v60, %v296_v56  ;;  %v394_v11 = vshrl.u32 %v376_v36, %v392_v3  ;;  %v397_v12 = vadd.s32 127, %v396_v4  ;;  %v406_v10 = vsub.s32 4, %v1081_v59 }
  0xd2   : > { %v1159_v15 = vshrl.u32 %v540_v52, 5  ;;  %v545_v58 = vshll.u32 %v888_v47, %v542_v62  ;;  %v485_v25 = vadd.s32 536870912, %v484_v14  ;;  %v546_v30 = vshrl.u32 %v889_v51, %v543_v8 }
  0xd3   : > { %v300_v6 = vxor.u32 2147483648, %v299_v63  ;;  %v395_v50 = vor.u32 %v394_v11, %v393_v9  ;;  %v398_v21 = vshll.u32 %v397_v12, 23  ;;  %v549_v27 = vshrl.u32 %v890_v53, %v543_v8 }
  0xd4   : > { %v552_v31 = vshrl.u32 %v891_v55, %v543_v8  ;;  %v1168_v24 = vshrl.u32 %v485_v25, 30  ;;  %v548_v33 = vshll.u32 %v889_v51, %v542_v62  ;;  %v551_v34 = vshll.u32 %v890_v53, %v542_v62 }
  0xd5   : > { %v301_v18 = vsel %vm218_vm14, %v300_v6, %v299_v63  ;;  %v399_v32 = vor.u32 4788187, %v398_v21  ;;  %v402_v26 = vcvt.s32.f32 %v395_v50  ;;  %v554_v35 = vshll.u32 %v891_v55, %v542_v62 }
  0xd6   : > { %v304_v19 = vsel %vm1135_vm4, %v975_v16, %v301_v18  ;;  %v555_v37 = vshrl.u32 %v892_v57, %v543_v8  ;;  %v487_v39 = vshll.u32 %v1168_v24, 30  ;;  %v557_v40 = vshll.u32 %v892_v57, %v542_v62 }
  0xd7   : > { %809 = vcosq.f32 %v304_v19  ;;  %v400_v28 = vand.u32 2147483647, %v399_v32  ;;  %v558_v44 = vshrl.u32 %v893_v0, %v543_v8  ;;  %v547_v46 = vor.u32 %v546_v30, %v545_v58 }
  0xd8   : > { %811 = vsinq.f32 %v304_v19  ;;  %v550_v48 = vor.u32 %v549_v27, %v548_v33  ;;  %v553_v49 = vor.u32 %v552_v31, %v551_v34  ;;  %v556_v52 = vor.u32 %v555_v37, %v554_v35 }
  0xd9   : > { %vm1179_vm8 = vcmp.le.f32.partialorder %v320_v22, 0.7853982  ;;  %v403_v53 = vmul.f32 %v402_v26, %v400_v28  ;;  %v1183_v55 = vsub.s32 %v484_v14, %v487_v39  ;;  %v559_v54 = vor.u32 %v558_v44, %v557_v40 }
  0xda   : > { %v310_v56 = vand.u32 3, %v309_v7  ;;  %v407_v57 = vsel %vm322_vm7, %v406_v10, %v1081_v59  ;;  %v536_v0 = vor.u32 8388608, %v1148_v2  ;;  %vm560_vm9 = vcmp.lt.s32.totalorder %v1159_v15, 1 }
  0xdb   : > { %v404_v60 = vxor.u32 2147483648, %v403_v53  ;;  %v490_v61 = vsub.s32 0, %v1183_v55  ;;  %vm562_vm10 = vcmp.lt.s32.totalorder %v1159_v15, 3  ;;  %vm563_vm11 = vcmp.lt.s32.totalorder %v1159_v15, 4 }
  0xdc   : > { %v565_v22 = vsel %vm563_vm11, %v553_v49, 2102212464  ;;  %v568_v13 = vsel %vm560_vm9, %v547_v46, %v550_v48  ;;  %v569_v62 = vsel %vm563_vm11, %v556_v52, 920167782  ;;  %v573_v63 = vsel %vm563_vm11, %v559_v54, 1326507024 }
  0xdd   : > { %v405_v59 = vsel %vm322_vm7, %v404_v60, %v403_v53  ;;  %v729_v1 = vmin.u32 %v490_v61, %v1183_v55  ;;  %v570_v20 = vsel %vm562_vm10, %v553_v49, %v569_v62  ;;  %v572_v2 = vsel %vm560_vm9, %v550_v48, %v553_v49 }
  0xde   : > { %vm308_vm12 = vweird.f32 %v975_v16  ;;  %v408_v36 = vsel %vm1179_vm8, %v977_v17, %v405_v59  ;;  %v544_v3 = vshrl.u32 %v888_v47, %v543_v8  ;;  %vm561_vm13 = vcmp.lt.s32.totalorder %v1159_v15, 2 }
  0xdf   : > { %v574_v4 = vsel %vm562_vm10, %v556_v52, %v573_v63  ;;  %813 = vcosq.f32 %v408_v36  ;;  %v492_v5 = vclz %v729_v1  ;;  %v571_v6 = vsel %vm561_vm13, %v568_v13, %v570_v20 }
  0xe0   : > { %v576_v7 = vshll.u32 %v536_v0, 8  ;;  %815 = vsinq.f32 %v408_v36  ;;  %v564_v29 = vsel %vm560_vm9, %v544_v3, %v547_v46  ;;  %v566_v47 = vsel %vm562_vm10, %v550_v48, %v565_v22 }
  0xe1   : > { %v575_v8 = vsel %vm561_vm13, %v572_v2, %v574_v4  ;;  %v409_v11 = vsel %vm1179_vm8, 0, %v407_v57  ;;  %v730_v12 = vadd.s32 4294967294, %v492_v5  ;;  %vm311_vm14 = vcmp.lt.s32.totalorder %v310_v56, 2 }
  0xe2   : > { %v1221_v14 = vmul.u32.u64.low %v576_v7, %v575_v8  ;;  %v1222_v18 = vmul.u32.u64.high %v576_v7, %v575_v8, %v1221_v14  ;;  %v1226_v19 = vmul.u32.u64.low %v576_v7, %v571_v6  ;;  %v1227_v50 = vmul.u32.u64.high %v576_v7, %v571_v6, %v1226_v19 }
  0xe3   : > { %vm315_vm15 = vcmp.eq.s32.totalorder %v310_v56, 2  ;;  %vm731_vm0 = vcmp.lt.s32.totalorder %v730_v12, 0  ;;  %v567_v25 = vsel %vm561_vm13, %v564_v29, %v566_v47  ;;  %vm312_vm1 = vcmp.eq.s32.totalorder %v310_v56, 0 }
  0xe4   : > { %v810_v9 = vpop.eup %809  ;;  %v413_v27 = vadd.s32 3, %v409_v11  ;;  %v495_v31 = vsel %vm731_vm0, 0, %v730_v12  ;;  %v480_v33 = vadd.s32 %v1129_v43, %v1118_v38  ;;  %v583_v37 = vmul.u32 %v576_v7, %v567_v25 }
  0xe5   : > { %v812_v10 = vpop.eup %811  ;;  %v316_v58 = vxor.u32 2147483648, %v810_v9  ;;  %v496_v26 = vsub.s32 32, %v495_v31  ;;  %v500_v34 = vsub.s32 4294967266, %v495_v31  ;;  %vm585_vm2 = vc.u32 %v1222_v18, %v1226_v19 }
  0xe6   : > { %v313_v21 = vxor.u32 2147483648, %v812_v10  ;;  %v586_v28 = vadd.s32 1, %v1227_v50  ;;  %v497_v39 = vshll.u32 %v1183_v55, %v495_v31  ;;  %v414_v49 = vand.u32 3, %v413_v27 }
  0xe7   : > { %v317_v30 = vsel %vm315_vm15, %v316_v58, %v812_v10  ;;  %v498_v40 = vshrl.u32 %v480_v33, %v496_v26  ;;  %v501_v44 = vadd.s32 127, %v500_v34  ;;  %vm412_vm6 = vweird.f32 %v977_v17 }
  0xe8   : > { %v314_v32 = vsel %vm312_vm1, %v810_v9, %v313_v21  ;;  %v587_v46 = vsel %vm585_vm2, %v586_v28, %v1227_v50  ;;  %vm419_vm3 = vcmp.eq.s32.totalorder %v414_v49, 2  ;;  %vm416_vm4 = vcmp.eq.s32.totalorder %v414_v49, 0 }
  0xe9   : > { %v318_v35 = vsel %vm311_vm14, %v314_v32, %v317_v30  ;;  %v499_v38 = vor.u32 %v498_v40, %v497_v39  ;;  %v502_v43 = vshll.u32 %v501_v44, 23  ;;  %v588_v48 = vadd.s32 %v587_v46, %v583_v37 }
  0xea   : > { %v319_v15 = vsel %vm308_vm12, nan, %v318_v35  ;;  %vm415_vm5 = vcmp.lt.s32.totalorder %v414_v49, 2  ;;  %vm426_vm7 = vcmp.lt.s32.totalorder %v982_v23, 0  ;;  %v510_v20 = vsub.s32 4, %v1168_v24 }
  0xeb   : > { %632 = vst [vmem:[%s1242_s8] sm:$0xff] %v319_v15  ;;  %v503_v52 = vor.u32 4788187, %v502_v43  ;;  %v589_v51 = vadd.s32 536870912, %v588_v48  ;;  %v506_v57 = vcvt.s32.f32 %v499_v38  ;;  %vm425_vm8 = vcmp.le.f32.partialorder %v424_v45, 0.7853982 }
  0xec   : > { %v814_v53 = vpop.eup %813  ;;  %v511_v17 = vsel %vm426_vm7, %v510_v20, %v1168_v24  ;;  %v584_v8 = vadd.s32 %v1226_v19, %v1222_v18  ;;  %vm516_vm13 = vweird.f32 %v982_v23  ;;  %vm530_vm14 = vcmp.lt.s32.totalorder %v990_v42, 0 }
  0xed   : > { %v816_v54 = vpop.eup %815  ;;  %v420_v16 = vxor.u32 2147483648, %v814_v53  ;;  %v504_v56 = vand.u32 2147483647, %v503_v52  ;;  %v1245_v55 = vshrl.u32 %v589_v51, 30  ;;  %v513_v6 = vsel %vm425_vm8, 0, %v511_v17 }
  0xee   : > { %v417_v0 = vxor.u32 2147483648, %v816_v54  ;;  %v517_v29 = vadd.s32 3, %v513_v6  ;;  %vm529_vm15 = vcmp.le.f32.partialorder %v528_v41, 0.7853982 }
  0xef   : > { %v421_v60 = vsel %vm419_vm3, %v420_v16, %v816_v54  ;;  %v507_v61 = vmul.f32 %v506_v57, %v504_v56  ;;  %v591_v22 = vshll.u32 %v1245_v55, 30  ;;  %v614_v37 = vsub.s32 4, %v1245_v55 }
  0xf0   : > { %v418_v13 = vsel %vm416_vm4, %v814_v53, %v417_v0  ;;  %v518_v10 = vand.u32 3, %v517_v29  ;;  %vm620_vm3 = vweird.f32 %v990_v42 }
  0xf1   : > { %v422_v62 = vsel %vm415_vm5, %v418_v13, %v421_v60  ;;  %v508_v63 = vxor.u32 2147483648, %v507_v61  ;;  %v592_v59 = vsub.s32 %v588_v48, %v591_v22 }
  0xf2   : > { %v423_v1 = vsel %vm412_vm6, nan, %v422_v62  ;;  %vm523_vm10 = vcmp.eq.s32.totalorder %v518_v10, 2  ;;  %vm520_vm11 = vcmp.eq.s32.totalorder %v518_v10, 0  ;;  %vm519_vm12 = vcmp.lt.s32.totalorder %v518_v10, 2 }
  0xf3   : > { %v509_v2 = vsel %vm426_vm7, %v508_v63, %v507_v61  ;;  %v594_v36 = vsub.s32 0, %v592_v59  ;;  %633 = vst [vmem:[%s1242_s8 + $0x8] sm:$0xff] %v423_v1 }
  0xf4   : > { %v512_v3 = vsel %vm425_vm8, %v982_v23, %v509_v2  ;;  %v615_v23 = vsel %vm530_vm14, %v614_v37, %v1245_v55 }
  0xf5   : > { %817 = vcosq.f32 %v512_v3  ;;  %v733_v4 = vmin.u32 %v594_v36, %v592_v59  ;;  %v617_v39 = vsel %vm529_vm15, 0, %v615_v23 }
  0xf6   : > { %819 = vsinq.f32 %v512_v3  ;;  %v621_v40 = vadd.s32 3, %v617_v39 }
  0xf7   : > { %v596_v5 = vclz %v733_v4 }
  0xf8   : > { %v622_v44 = vand.u32 3, %v621_v40 }
  0xf9   : > { %v734_v7 = vadd.s32 4294967294, %v596_v5 }
  0xfa   : > { %vm627_vm0 = vcmp.eq.s32.totalorder %v622_v44, 2  ;;  %vm624_vm1 = vcmp.eq.s32.totalorder %v622_v44, 0  ;;  %vm623_vm2 = vcmp.lt.s32.totalorder %v622_v44, 2 }
  0xfb   : > { %vm735_vm9 = vcmp.lt.s32.totalorder %v734_v7, 0 }
  0xfc   : > { %v599_v47 = vsel %vm735_vm9, 0, %v734_v7 }
  0xfd   : > { %v600_v45 = vsub.s32 32, %v599_v47  ;;  %v604_v9 = vsub.s32 4294967266, %v599_v47  ;;  %v601_v11 = vshll.u32 %v592_v59, %v599_v47 }
  0xff   : > { %v602_v12 = vshrl.u32 %v584_v8, %v600_v45  ;;  %v605_v14 = vadd.s32 127, %v604_v9 }
 0x101   : > { %v603_v58 = vor.u32 %v602_v12, %v601_v11  ;;  %v606_v50 = vshll.u32 %v605_v14, 23 }
 0x102   : > { %v818_v21 = vpop.eup %817 }
 0x103   : > { %v820_v24 = vpop.eup %819  ;;  %v524_v25 = vxor.u32 2147483648, %v818_v21  ;;  %v607_v30 = vor.u32 4788187, %v606_v50  ;;  %v610_v33 = vcvt.s32.f32 %v603_v58 }
 0x104   : > { %v521_v27 = vxor.u32 2147483648, %v820_v24 }
 0x105   : > { %v525_v31 = vsel %vm523_vm10, %v524_v25, %v820_v24  ;;  %v608_v32 = vand.u32 2147483647, %v607_v30 }
 0x106   : > { %v522_v18 = vsel %vm520_vm11, %v818_v21, %v521_v27 }
 0x107   : > { %v526_v19 = vsel %vm519_vm12, %v522_v18, %v525_v31  ;;  %v611_v26 = vmul.f32 %v610_v33, %v608_v32 }
 0x108   : > { %v527_v34 = vsel %vm516_vm13, nan, %v526_v19 }
 0x109   : > { %v612_v35 = vxor.u32 2147483648, %v611_v26  ;;  %634 = vst [vmem:[%s1242_s8 + $0x10] sm:$0xff] %v527_v34 }
 0x10b   : > { %v613_v28 = vsel %vm530_vm14, %v612_v35, %v611_v26 }
 0x10c   : > { %v616_v15 = vsel %vm529_vm15, %v990_v42, %v613_v28 }
 0x10d   : > { %821 = vcosq.f32 %v616_v15 }
 0x10e   : > { %823 = vsinq.f32 %v616_v15 }
 0x11a   : > { %v822_v46 = vpop.eup %821 }
 0x11b   : > { %v824_v38 = vpop.eup %823  ;;  %v628_v43 = vxor.u32 2147483648, %v822_v46 }
 0x11c   : > { %v625_v48 = vxor.u32 2147483648, %v824_v38 }
 0x11d   : > { %v629_v41 = vsel %vm627_vm0, %v628_v43, %v824_v38 }
 0x11e   : > { %v626_v49 = vsel %vm624_vm1, %v822_v46, %v625_v48 }
 0x11f   : > { %v630_v52 = vsel %vm623_vm2, %v626_v49, %v629_v41 }
 0x120   : > { %v631_v51 = vsel %vm620_vm3, nan, %v630_v52 }
 0x121   : > { %635 = vst [vmem:[%s1242_s8 + $0x18] sm:$0xff] %v631_v51 }
 0x122   : > { %838 = shalt.err (!%p835_p3)
}
 0x123   : > { %s839_s27 = scalar_lea.hbm %s1271_s19, 512  ;;  %s843_s30 = scalar_lea.hbm %s1322_s3, 1024 }
 0x124   : > { %p840_p4 = scmp.ne.s32.totalorder %s1271_s19, %s839_s27  ;;  %p844_p9 = scmp.lt.s32.totalorder %s1271_s19, %s1322_s3 }
 0x125   : > { %p845_p10 = scmp.lt.s32.totalorder %s843_s30, %s839_s27 }
 0x126   : > { %p841_p7 = pnand %p840_p4, %p955_p5 }
 0x127   : > { %p846_p11 = por %p845_p10, %p844_p9 }
 0x128   : > { %p842_p8 = pneg %p841_p7 }
 0x12a   : > { %p847_p12 = pnand %p846_p11, %p842_p8 }
 0x12c   : > { %850 = shalt.err (!%p847_p12)
}
 0x12d   : > { %s895_s6 = smov 256   ;;  %s896_s7 = smov 16  }
 0x12e   : > { %760 = dma.vmem_to_hbm [thread:$0]  (%p955_p5), %s1273_s10, 512, %s1271_s19, %s1279_s16, %s895_s6, %s895_s6, %s896_s7  }
 0x12f PF: > { %p766_p13 = scmp.ge.s32.totalorder %s885_s15, 2  ;;  %s666_s8 = sand.u32 1, %s873_s12  }
 0x130   : > { %s667_s9 = scalar_lea.sflag [#allocation3], %s666_s8 }
 0x131   : > { %p763_p0 = pnand %p766_p13, %p959_p6 }
 0x133   : > { %p764_p1 = pneg %p763_p0 }
 0x135   : > { %868 = dma.done.wait (%p764_p1), %s667_s9, 512  }
 0x136   : > { %870 = vsyncadd (%p764_p1), %s667_s9, 4294966784  ;;  %p13_p2 = scmp.ge.s32.totalorder %s942_s18, 4   ;;  %s1329_s12 = smov %s877_s13 }
 0x137   : > { %s1330_s13 = smov %s881_s14  ;;  %s1331_s14 = smov %s953_s21 }
 0x138   : > { %s1332_s15 = smov %s942_s18  ;;  %15 = sbr.rel (!%p13_p2) target bundleno = 3 (0x3), region = 67 }
 0x13d   :  { %672 = vsyncpa [#allocation3], 1 }
 0x13e   :  { %674 = vsyncpa [#allocation3 + $0x1], 1 }

</bundles_post_ra>
